<compile_context>
chip_gen: v7x
topology: tpu7x:2x2x1
jax: 0.10.0
libtpu: 0.0.40
codegen_flags: <defaults>
</compile_context>

<pallas_src>
import numpy as np
import jax
import jax.numpy as jnp
from jax.experimental import pallas as pl
from jax.experimental.pallas import tpu as pltpu

# ----------------------------- problem sizes --------------------------------
B, C, H, W = 2, 16, 16, 16          # channels=16  ->  channels//8 = 2
C8 = C // 8
K = 7                                # spatial-attention kernel size
PAD = 3                              # reflect padding
HW = H * W                           # 256 -> lane axis (two full 128-lane tiles)


# --------------- reflect pad + 7x7 conv folded into matrices ----------------
def _reflect(i, n):
    if i < 0:
        i = -i
    if i >= n:
        i = 2 * (n - 1) - i
    return i


def _build_conv_matrices(w_sp):
    """Fold reflect padding + the 7x7 taps into two (HW, HW) matrices so that
    sa_logit_row = maxp_row @ Mmax + avgp_row @ Mavg  (row vectors of len HW).
    Index bookkeeping is static numpy; the values come from the (runtime) conv
    weights via a scatter-add, so weight updates never retrace the kernel."""
    src, dst, tap = [], [], []
    for oy in range(H):
        for ox in range(W):
            j = oy * W + ox
            for dy in range(K):
                for dx in range(K):
                    iy = _reflect(oy + dy - PAD, H)
                    ix = _reflect(ox + dx - PAD, W)
                    src.append(iy * W + ix)
                    dst.append(j)
                    tap.append(dy * K + dx)
    src = np.asarray(src)
    dst = np.asarray(dst)
    tap = np.asarray(tap)
    w_flat = jnp.asarray(w_sp, jnp.float32).reshape(K * K, 2)
    mmax = jnp.zeros((HW, HW), jnp.float32).at[src, dst].add(w_flat[tap, 0])
    mavg = jnp.zeros((HW, HW), jnp.float32).at[src, dst].add(w_flat[tap, 1])
    return mmax, mavg


# ------------------------------ fused kernel ---------------------------------
def _fused_kernel(x_ref, r_ref, wr_ref, br_ref, w1_ref, b1_ref, w2_ref, b2_ref,
                  mmax_ref, mavg_ref, bsp_ref, out_ref):
    # x_ref: (C, HW)   r_ref: (3, HW)   -- lane axis = HW (dense)
    x = x_ref[...]
    r = r_ref[...]
    wr = wr_ref[...]                                     # (C, 3)

    # r_conv: 1x1 conv over 3 input channels + ReLU.  K=3 is too small for the
    # MXU, so use 3 broadcast MACs on the VPU.
    rfeat = (wr[:, 0:1] * r[0:1, :]
             + wr[:, 1:2] * r[1:2, :]
             + wr[:, 2:3] * r[2:3, :]) + br_ref[...]     # (C, HW)
    rfeat = jnp.maximum(rfeat, 0.0)

    # channel attention: global avg pool (lane reduce) + tiny squeeze/excite MLP
    # kept off the MXU (VPU broadcast-multiplies + XLU reductions).
    s = x + rfeat
    pooled = jnp.sum(s, axis=1, keepdims=True) * (1.0 / HW)              # (C, 1)
    hidden = jnp.sum(w1_ref[...] * pooled, axis=0, keepdims=True) + b1_ref[...]
    hidden = jnp.maximum(hidden, 0.0)                                    # (1, C8)
    ca = jax.nn.sigmoid(jnp.sum(w2_ref[...] * hidden, axis=1, keepdims=True)
                        + b2_ref[...])                                   # (C, 1)

    # spatial attention: channel max/mean (sublane reduces) -> reflect-padded
    # 7x7 conv expressed as two MXU matmuls against the folded (HW, HW) maps.
    maxp = jnp.max(x, axis=0, keepdims=True)                             # (1, HW)
    avgp = jnp.sum(x, axis=0, keepdims=True) * (1.0 / C)                 # (1, HW)
    logit = (jnp.dot(maxp, mmax_ref[...], preferred_element_type=jnp.float32)
             + jnp.dot(avgp, mavg_ref[...], preferred_element_type=jnp.float32)
             + bsp_ref[...])                                             # (1, HW)
    sa = jax.nn.sigmoid(logit)

    # fused output: x * ca * sa  (column x row broadcast, lane-dense store)
    out_ref[...] = (x * ca * sa).astype(out_ref.dtype)


# -------------------------------- wrapper ------------------------------------
def reflection_guided_attention(x_nchw, r_nchw, params):
    wr, br, w1, b1, w2, b2, w_sp, b_sp = params
    mmax, mavg = _build_conv_matrices(w_sp)

    # NCHW stays NCHW: only free reshapes, no transposes.
    x3 = jnp.asarray(x_nchw, jnp.float32).reshape(B, C, HW)
    r3 = jnp.asarray(r_nchw, jnp.float32).reshape(B, 3, HW)

    wr_k = jnp.asarray(wr, jnp.float32).T                 # (C, 3)
    br_k = jnp.asarray(br, jnp.float32).reshape(C, 1)     # (C, 1)
    w1_k = jnp.asarray(w1, jnp.float32)                   # (C, C8)
    b1_k = jnp.asarray(b1, jnp.float32).reshape(1, C8)    # (1, C8)
    w2_k = jnp.asarray(w2, jnp.float32).T                 # (C, C8)
    b2_k = jnp.asarray(b2, jnp.float32).reshape(C, 1)     # (C, 1)
    bsp_k = jnp.asarray(b_sp, jnp.float32).reshape(1, 1)  # (1, 1)

    const = lambda b: (0, 0)

    out3 = pl.pallas_call(
        _fused_kernel,
        grid=(B,),
        in_specs=[
            pl.BlockSpec((None, C, HW), lambda b: (b, 0, 0)),   # x
            pl.BlockSpec((None, 3, HW), lambda b: (b, 0, 0)),   # R
            pl.BlockSpec((C, 3), const),                        # wr
            pl.BlockSpec((C, 1), const),                        # br
            pl.BlockSpec((C, C8), const),                       # w1
            pl.BlockSpec((1, C8), const),                       # b1
            pl.BlockSpec((C, C8), const),                       # w2 (transposed)
            pl.BlockSpec((C, 1), const),                        # b2
            pl.BlockSpec((HW, HW), const),                      # Mmax
            pl.BlockSpec((HW, HW), const),                      # Mavg
            pl.BlockSpec((1, 1), const),                        # b_sp
        ],
        out_specs=pl.BlockSpec((None, C, HW), lambda b: (b, 0, 0)),
        out_shape=jax.ShapeDtypeStruct((B, C, HW), jnp.float32),
        compiler_params=pltpu.CompilerParams(
            dimension_semantics=("parallel",)),   # v7x: one batch element per TC
    )(x3, r3, wr_k, br_k, w1_k, b1_k, w2_k, b2_k, mmax, mavg, bsp_k)

    return out3.reshape(B, C, H, W)


# ---------------------------- pure-JAX reference -----------------------------
def reference(x, r, params):
    wr, br, w1, b1, w2, b2, w_sp, b_sp = params
    w_sp = jnp.asarray(w_sp)
    hp = jax.lax.Precision.HIGHEST   # exact-f32 ground truth
    rfeat = jnp.maximum(jnp.einsum("bihw,ic->bchw", r, wr, precision=hp)
                        + br.reshape(1, C, 1, 1), 0.0)
    s = x + rfeat
    pooled = jnp.mean(s, axis=(2, 3))                               # (B, C)
    hidden = jnp.maximum(jnp.dot(pooled, w1, precision=hp) + b1, 0.0)
    ca = jax.nn.sigmoid(jnp.dot(hidden, w2, precision=hp) + b2)     # (B, C)
    maxp = jnp.max(x, axis=1)                                       # (B, H, W)
    avgp = jnp.mean(x, axis=1)
    mpp = jnp.pad(maxp, ((0, 0), (PAD, PAD), (PAD, PAD)), mode="reflect")
    app = jnp.pad(avgp, ((0, 0), (PAD, PAD), (PAD, PAD)), mode="reflect")
    sa = jnp.full((B, H, W), float(b_sp), jnp.float32)
    for dy in range(K):
        for dx in range(K):
            sa = sa + mpp[:, dy:dy + H, dx:dx + W] * w_sp[dy, dx, 0]
            sa = sa + app[:, dy:dy + H, dx:dx + W] * w_sp[dy, dx, 1]
    sa = jax.nn.sigmoid(sa)
    return x * ca[:, :, None, None] * sa[:, None, :, :]


# ---------------------------------- main --------------------------------------
if __name__ == "__main__":
    key = jax.random.PRNGKey(0)
    ks = jax.random.split(key, 10)

    # deterministic synthetic parameters (shapes from the module __init__)
    wr = jax.random.normal(ks[0], (3, C), jnp.float32) * 0.3     # Conv2d(3,C,1).weight^T
    br = jax.random.normal(ks[1], (1, C), jnp.float32) * 0.1
    w1 = jax.random.normal(ks[2], (C, C8), jnp.float32) * 0.3    # Conv2d(C,C//8,1)
    b1 = jax.random.normal(ks[3], (1, C8), jnp.float32) * 0.1
    w2 = jax.random.normal(ks[4], (C8, C), jnp.float32) * 0.3    # Conv2d(C//8,C,1)
    b2 = jax.random.normal(ks[5], (1, C), jnp.float32) * 0.1
    w_sp = np.asarray(jax.random.normal(ks[6], (K, K, 2), jnp.float32) * 0.1)  # Conv2d(2,1,7)
    b_sp = float(jax.random.normal(ks[7], (), jnp.float32) * 0.1)
    params = (wr, br, w1, b1, w2, b2, w_sp, b_sp)

    x = jax.random.normal(ks[8], (B, C, H, W), jnp.float32)      # NCHW like PyTorch
    R = jax.random.normal(ks[9], (B, 3, H, W), jnp.float32)

    out = reflection_guided_attention(x, R, params)
    out = jax.block_until_ready(out)

    ref = jax.block_until_ready(reference(x, R, params))
    # Tolerance 5e-3: the in-kernel spatial-attention matmuls use the MXU at
    # default precision (bf16 passes for f32 operands); everything else is
    # exact f32 on the VPU/XLU.
    np.testing.assert_allclose(np.asarray(out), np.asarray(ref),
                               rtol=5e-3, atol=5e-3)

    print("KERNEL_OK")
</pallas_src>

<mosaic_0001>
module attributes {stable_mosaic.version = 11 : i64} {
  func.func @_fused_kernel(%arg0: i32, %arg1: memref<1x16x256xf32, #tpu.memory_space<vmem>>, %arg2: memref<1x3x256xf32, #tpu.memory_space<vmem>>, %arg3: memref<16x3xf32, #tpu.memory_space<vmem>>, %arg4: memref<16x1xf32, #tpu.memory_space<vmem>>, %arg5: memref<16x2xf32, #tpu.memory_space<vmem>>, %arg6: memref<1x2xf32, #tpu.memory_space<vmem>>, %arg7: memref<16x2xf32, #tpu.memory_space<vmem>>, %arg8: memref<16x1xf32, #tpu.memory_space<vmem>>, %arg9: memref<256x256xf32, #tpu.memory_space<vmem>>, %arg10: memref<256x256xf32, #tpu.memory_space<vmem>>, %arg11: memref<1x1xf32, #tpu.memory_space<vmem>>, %arg12: memref<1x16x256xf32, #tpu.memory_space<vmem>>) attributes {dimension_semantics = [#tpu.dimension_semantics<parallel>], iteration_bounds = array<i64: 2>, scalar_prefetch = 0 : i64, scratch_operands = 0 : i64, tpu.core_type = #tpu.core_type<tc>, window_params = [{transform_indices = @transform_0, window_bounds = array<i64: 1, 16, 256>}, {transform_indices = @transform_1, window_bounds = array<i64: 1, 3, 256>}, {pipeline_mode = #tpu.pipeline_mode<synchronous>, transform_indices = @transform_2, window_bounds = array<i64: 16, 3>}, {pipeline_mode = #tpu.pipeline_mode<synchronous>, transform_indices = @transform_3, window_bounds = array<i64: 16, 1>}, {pipeline_mode = #tpu.pipeline_mode<synchronous>, transform_indices = @transform_4, window_bounds = array<i64: 16, 2>}, {pipeline_mode = #tpu.pipeline_mode<synchronous>, transform_indices = @transform_5, window_bounds = array<i64: 1, 2>}, {pipeline_mode = #tpu.pipeline_mode<synchronous>, transform_indices = @transform_6, window_bounds = array<i64: 16, 2>}, {pipeline_mode = #tpu.pipeline_mode<synchronous>, transform_indices = @transform_7, window_bounds = array<i64: 16, 1>}, {pipeline_mode = #tpu.pipeline_mode<synchronous>, transform_indices = @transform_8, window_bounds = array<i64: 256, 256>}, {pipeline_mode = #tpu.pipeline_mode<synchronous>, transform_indices = @transform_9, window_bounds = array<i64: 256, 256>}, {pipeline_mode = #tpu.pipeline_mode<synchronous>, transform_indices = @transform_10, window_bounds = array<i64: 1, 1>}, {transform_indices = @transform_11, window_bounds = array<i64: 1, 16, 256>}]} {
    %c0 = arith.constant 0 : index
    %c0_0 = arith.constant 0 : index
    %c0_1 = arith.constant 0 : index
    %0 = vector.load %arg1[%c0, %c0_0, %c0_1] : memref<1x16x256xf32, #tpu.memory_space<vmem>>, vector<1x16x256xf32>
    %1 = vector.shape_cast %0 : vector<1x16x256xf32> to vector<16x256xf32>
    %c0_2 = arith.constant 0 : index
    %c0_3 = arith.constant 0 : index
    %c0_4 = arith.constant 0 : index
    %2 = vector.load %arg2[%c0_2, %c0_3, %c0_4] : memref<1x3x256xf32, #tpu.memory_space<vmem>>, vector<1x3x256xf32>
    %3 = vector.shape_cast %2 : vector<1x3x256xf32> to vector<3x256xf32>
    %c0_5 = arith.constant 0 : index
    %c0_6 = arith.constant 0 : index
    %4 = vector.load %arg3[%c0_5, %c0_6] : memref<16x3xf32, #tpu.memory_space<vmem>>, vector<16x3xf32>
    %5 = vector.extract_strided_slice %4 {offsets = [0, 0], sizes = [16, 1], strides = [1, 1]} : vector<16x3xf32> to vector<16x1xf32>
    %6 = vector.extract_strided_slice %3 {offsets = [0, 0], sizes = [1, 256], strides = [1, 1]} : vector<3x256xf32> to vector<1x256xf32>
    %7 = vector.broadcast %5 : vector<16x1xf32> to vector<16x256xf32>
    %8 = vector.broadcast %6 : vector<1x256xf32> to vector<16x256xf32>
    %9 = arith.mulf %7, %8 : vector<16x256xf32>
    %10 = vector.extract_strided_slice %4 {offsets = [0, 1], sizes = [16, 1], strides = [1, 1]} : vector<16x3xf32> to vector<16x1xf32>
    %11 = vector.extract_strided_slice %3 {offsets = [1, 0], sizes = [1, 256], strides = [1, 1]} : vector<3x256xf32> to vector<1x256xf32>
    %12 = vector.broadcast %10 : vector<16x1xf32> to vector<16x256xf32>
    %13 = vector.broadcast %11 : vector<1x256xf32> to vector<16x256xf32>
    %14 = arith.mulf %12, %13 : vector<16x256xf32>
    %15 = arith.addf %9, %14 : vector<16x256xf32>
    %16 = vector.extract_strided_slice %4 {offsets = [0, 2], sizes = [16, 1], strides = [1, 1]} : vector<16x3xf32> to vector<16x1xf32>
    %17 = vector.extract_strided_slice %3 {offsets = [2, 0], sizes = [1, 256], strides = [1, 1]} : vector<3x256xf32> to vector<1x256xf32>
    %18 = vector.broadcast %16 : vector<16x1xf32> to vector<16x256xf32>
    %19 = vector.broadcast %17 : vector<1x256xf32> to vector<16x256xf32>
    %20 = arith.mulf %18, %19 : vector<16x256xf32>
    %21 = arith.addf %15, %20 : vector<16x256xf32>
    %c0_7 = arith.constant 0 : index
    %c0_8 = arith.constant 0 : index
    %22 = vector.load %arg4[%c0_7, %c0_8] : memref<16x1xf32, #tpu.memory_space<vmem>>, vector<16x1xf32>
    %23 = vector.broadcast %22 : vector<16x1xf32> to vector<16x256xf32>
    %24 = arith.addf %21, %23 : vector<16x256xf32>
    %cst = arith.constant 0.000000e+00 : f32
    %25 = vector.broadcast %cst : f32 to vector<16x256xf32>
    %26 = arith.maximumf %24, %25 : vector<16x256xf32>
    %27 = arith.addf %1, %26 : vector<16x256xf32>
    %cst_9 = arith.constant dense<0.000000e+00> : vector<16xf32>
    %28 = vector.multi_reduction <add>, %27, %cst_9 [1] : vector<16x256xf32> to vector<16xf32>
    %29 = vector.shape_cast %28 : vector<16xf32> to vector<16x1xf32>
    %cst_10 = arith.constant 3.906250e-03 : f32
    %30 = vector.broadcast %cst_10 : f32 to vector<16x1xf32>
    %31 = arith.mulf %29, %30 : vector<16x1xf32>
    %c0_11 = arith.constant 0 : index
    %c0_12 = arith.constant 0 : index
    %32 = vector.load %arg5[%c0_11, %c0_12] : memref<16x2xf32, #tpu.memory_space<vmem>>, vector<16x2xf32>
    %33 = vector.broadcast %31 : vector<16x1xf32> to vector<16x2xf32>
    %34 = arith.mulf %32, %33 : vector<16x2xf32>
    %cst_13 = arith.constant dense<0.000000e+00> : vector<2xf32>
    %35 = vector.multi_reduction <add>, %34, %cst_13 [0] : vector<16x2xf32> to vector<2xf32>
    %36 = vector.shape_cast %35 : vector<2xf32> to vector<1x2xf32>
    %c0_14 = arith.constant 0 : index
    %c0_15 = arith.constant 0 : index
    %37 = vector.load %arg6[%c0_14, %c0_15] : memref<1x2xf32, #tpu.memory_space<vmem>>, vector<1x2xf32>
    %38 = arith.addf %36, %37 : vector<1x2xf32>
    %cst_16 = arith.constant 0.000000e+00 : f32
    %39 = vector.broadcast %cst_16 : f32 to vector<1x2xf32>
    %40 = arith.maximumf %38, %39 : vector<1x2xf32>
    %c0_17 = arith.constant 0 : index
    %c0_18 = arith.constant 0 : index
    %41 = vector.load %arg7[%c0_17, %c0_18] : memref<16x2xf32, #tpu.memory_space<vmem>>, vector<16x2xf32>
    %42 = vector.broadcast %40 : vector<1x2xf32> to vector<16x2xf32>
    %43 = arith.mulf %41, %42 : vector<16x2xf32>
    %cst_19 = arith.constant dense<0.000000e+00> : vector<16xf32>
    %44 = vector.multi_reduction <add>, %43, %cst_19 [1] : vector<16x2xf32> to vector<16xf32>
    %45 = vector.shape_cast %44 : vector<16xf32> to vector<16x1xf32>
    %c0_20 = arith.constant 0 : index
    %c0_21 = arith.constant 0 : index
    %46 = vector.load %arg8[%c0_20, %c0_21] : memref<16x1xf32, #tpu.memory_space<vmem>>, vector<16x1xf32>
    %47 = arith.addf %45, %46 : vector<16x1xf32>
    %48 = arith.negf %47 : vector<16x1xf32>
    %49 = math.exp %48 : vector<16x1xf32>
    %cst_22 = arith.constant 1.000000e+00 : f32
    %50 = vector.broadcast %cst_22 : f32 to vector<16x1xf32>
    %51 = arith.addf %50, %49 : vector<16x1xf32>
    %52 = arith.divf %50, %51 : vector<16x1xf32>
    %cst_23 = arith.constant dense<0xFF800000> : vector<256xf32>
    %53 = vector.multi_reduction <maximumf>, %1, %cst_23 [0] : vector<16x256xf32> to vector<256xf32>
    %54 = vector.shape_cast %53 : vector<256xf32> to vector<1x256xf32>
    %cst_24 = arith.constant dense<0.000000e+00> : vector<256xf32>
    %55 = vector.multi_reduction <add>, %1, %cst_24 [0] : vector<16x256xf32> to vector<256xf32>
    %56 = vector.shape_cast %55 : vector<256xf32> to vector<1x256xf32>
    %cst_25 = arith.constant 6.250000e-02 : f32
    %57 = vector.broadcast %cst_25 : f32 to vector<1x256xf32>
    %58 = arith.mulf %56, %57 : vector<1x256xf32>
    %c0_26 = arith.constant 0 : index
    %c0_27 = arith.constant 0 : index
    %59 = vector.load %arg9[%c0_26, %c0_27] : memref<256x256xf32, #tpu.memory_space<vmem>>, vector<256x256xf32>
    %cst_28 = arith.constant dense<0.000000e+00> : vector<1x256xf32>
    %60 = tpu.matmul %54, %59, %cst_28 {dimension_numbers = #tpu.dot_dimension_numbers<[1], [0], [0], [1], [0, 0, 1, 1], [], []>} : vector<1x256xf32>, vector<256x256xf32>, vector<1x256xf32> -> vector<1x256xf32>
    %c0_29 = arith.constant 0 : index
    %c0_30 = arith.constant 0 : index
    %61 = vector.load %arg10[%c0_29, %c0_30] : memref<256x256xf32, #tpu.memory_space<vmem>>, vector<256x256xf32>
    %cst_31 = arith.constant dense<0.000000e+00> : vector<1x256xf32>
    %62 = tpu.matmul %58, %61, %cst_31 {dimension_numbers = #tpu.dot_dimension_numbers<[1], [0], [0], [1], [0, 0, 1, 1], [], []>} : vector<1x256xf32>, vector<256x256xf32>, vector<1x256xf32> -> vector<1x256xf32>
    %63 = arith.addf %60, %62 : vector<1x256xf32>
    %c0_32 = arith.constant 0 : index
    %c0_33 = arith.constant 0 : index
    %64 = vector.load %arg11[%c0_32, %c0_33] : memref<1x1xf32, #tpu.memory_space<vmem>>, vector<1x1xf32>
    %65 = vector.broadcast %64 : vector<1x1xf32> to vector<1x256xf32>
    %66 = arith.addf %63, %65 : vector<1x256xf32>
    %67 = arith.negf %66 : vector<1x256xf32>
    %68 = math.exp %67 : vector<1x256xf32>
    %cst_34 = arith.constant 1.000000e+00 : f32
    %69 = vector.broadcast %cst_34 : f32 to vector<1x256xf32>
    %70 = arith.addf %69, %68 : vector<1x256xf32>
    %71 = arith.divf %69, %70 : vector<1x256xf32>
    %72 = vector.broadcast %52 : vector<16x1xf32> to vector<16x256xf32>
    %73 = arith.mulf %1, %72 : vector<16x256xf32>
    %74 = vector.broadcast %71 : vector<1x256xf32> to vector<16x256xf32>
    %75 = arith.mulf %73, %74 : vector<16x256xf32>
    %c0_35 = arith.constant 0 : index
    %c0_36 = arith.constant 0 : index
    %c0_37 = arith.constant 0 : index
    %76 = vector.load %arg12[%c0_35, %c0_36, %c0_37] : memref<1x16x256xf32, #tpu.memory_space<vmem>>, vector<1x16x256xf32>
    %77 = vector.shape_cast %76 : vector<1x16x256xf32> to vector<16x256xf32>
    %78 = vector.shape_cast %75 : vector<16x256xf32> to vector<1x16x256xf32>
    tpu.vector_store %arg12[%c0_35, %c0_36, %c0_37], %78 {strides = array<i32>} : memref<1x16x256xf32, #tpu.memory_space<vmem>>, vector<1x16x256xf32>,
    return
  }
  func.func @transform_0(%arg0: i32) -> (i32, i32, i32) {
    %c0_i32 = arith.constant 0 : i32
    %c0_i32_0 = arith.constant 0 : i32
    %c0_i32_1 = arith.constant 0 : i32
    return %arg0, %c0_i32, %c0_i32_0 : i32, i32, i32
  }
  func.func @transform_1(%arg0: i32) -> (i32, i32, i32) {
    %c0_i32 = arith.constant 0 : i32
    %c0_i32_0 = arith.constant 0 : i32
    %c0_i32_1 = arith.constant 0 : i32
    return %arg0, %c0_i32, %c0_i32_0 : i32, i32, i32
  }
  func.func @transform_2(%arg0: i32) -> (i32, i32) {
    %c0_i32 = arith.constant 0 : i32
    %c0_i32_0 = arith.constant 0 : i32
    %c0_i32_1 = arith.constant 0 : i32
    return %c0_i32, %c0_i32_0 : i32, i32
  }
  func.func @transform_3(%arg0: i32) -> (i32, i32) {
    %c0_i32 = arith.constant 0 : i32
    %c0_i32_0 = arith.constant 0 : i32
    %c0_i32_1 = arith.constant 0 : i32
    return %c0_i32, %c0_i32_0 : i32, i32
  }
  func.func @transform_4(%arg0: i32) -> (i32, i32) {
    %c0_i32 = arith.constant 0 : i32
    %c0_i32_0 = arith.constant 0 : i32
    %c0_i32_1 = arith.constant 0 : i32
    return %c0_i32, %c0_i32_0 : i32, i32
  }
  func.func @transform_5(%arg0: i32) -> (i32, i32) {
    %c0_i32 = arith.constant 0 : i32
    %c0_i32_0 = arith.constant 0 : i32
    %c0_i32_1 = arith.constant 0 : i32
    return %c0_i32, %c0_i32_0 : i32, i32
  }
  func.func @transform_6(%arg0: i32) -> (i32, i32) {
    %c0_i32 = arith.constant 0 : i32
    %c0_i32_0 = arith.constant 0 : i32
    %c0_i32_1 = arith.constant 0 : i32
    return %c0_i32, %c0_i32_0 : i32, i32
  }
  func.func @transform_7(%arg0: i32) -> (i32, i32) {
    %c0_i32 = arith.constant 0 : i32
    %c0_i32_0 = arith.constant 0 : i32
    %c0_i32_1 = arith.constant 0 : i32
    return %c0_i32, %c0_i32_0 : i32, i32
  }
  func.func @transform_8(%arg0: i32) -> (i32, i32) {
    %c0_i32 = arith.constant 0 : i32
    %c0_i32_0 = arith.constant 0 : i32
    %c0_i32_1 = arith.constant 0 : i32
    return %c0_i32, %c0_i32_0 : i32, i32
  }
  func.func @transform_9(%arg0: i32) -> (i32, i32) {
    %c0_i32 = arith.constant 0 : i32
    %c0_i32_0 = arith.constant 0 : i32
    %c0_i32_1 = arith.constant 0 : i32
    return %c0_i32, %c0_i32_0 : i32, i32
  }
  func.func @transform_10(%arg0: i32) -> (i32, i32) {
    %c0_i32 = arith.constant 0 : i32
    %c0_i32_0 = arith.constant 0 : i32
    %c0_i32_1 = arith.constant 0 : i32
    return %c0_i32, %c0_i32_0 : i32, i32
  }
  func.func @transform_11(%arg0: i32) -> (i32, i32, i32) {
    %c0_i32 = arith.constant 0 : i32
    %c0_i32_0 = arith.constant 0 : i32
    %c0_i32_1 = arith.constant 0 : i32
    return %arg0, %c0_i32, %c0_i32_0 : i32, i32, i32
  }
}

</mosaic_0001>

<bundles_post_ra>
// kernel: tpu_custom_call.1
= control target key start
LH: loop header
LB: loop body
LE: loop exit
PB: predicated region body
PF: predicated region fallthrough
CT: control target
= control target key end

     0   :  { %s1791_s0 = inlined_call_operand.vmem [shape: f32[2,16,256], index: 0, kind: input, shape index: {}]   ;;  %s1792_s1 = inlined_call_operand.vmem [shape: f32[2,3,256], index: 1, kind: input, shape index: {}]   ;;  %s1793_s2 = inlined_call_operand.vmem [shape: f32[16,3], index: 2, kind: input, shape index: {}]   ;;  %s1794_s3 = inlined_call_operand.vmem [shape: f32[16,1], index: 3, kind: input, shape index: {}]   ;;  %s1795_s4 = inlined_call_operand.vmem [shape: f32[16,2], index: 4, kind: input, shape index: {}]   ;;  %s1796_s5 = inlined_call_operand.vmem [shape: f32[1,2], index: 5, kind: input, shape index: {}]   ;;  %s1797_s6 = inlined_call_operand.vmem [shape: f32[16,2], index: 6, kind: input, shape index: {}]   ;;  %s1798_s7 = inlined_call_operand.vmem [shape: f32[16,1], index: 7, kind: input, shape index: {}]   ;;  %s1799_s8 = inlined_call_operand.hbm [shape: f32[256,256], index: 8, kind: input, shape index: {}]   ;;  %s1800_s9 = inlined_call_operand.hbm [shape: f32[256,256], index: 9, kind: input, shape index: {}]   ;;  %s1801_s10 = inlined_call_operand.<no memory space> [shape: f32[1,1], index: 10, kind: input, shape index: {}]   ;;  %s1802_s11 = inlined_call_operand.hbm [shape: f32[2,16,256], index: 11, kind: output, shape index: {}]  }
   0x1   :  { %v16_v0 = vstv %s1801_s10 }
   0x2   :  { %17 = vst [vmem:[#allocation2] sm:$0x1] %v16_v0 }
   0x3   :  { %18 = vsyncpa [#allocation4], 0 }
   0x4   :  { %19 = vsyncpa [#allocation7], 0 }
   0x5   :  { %20 = vsyncpa [#allocation5], 0 }
   0x6   :  { %22 = vsyncpa [#allocation5 + $0x1], 0  ;;  %s1533_s19 = smov 0   ;;  %s1535_s20 = smov 0  }
   0x7   :  { %s1537_s21 = smov 0   ;;  %s1539_s22 = smov 0  }
   0x8 LB: > { %1810 = sst [smem:[#allocation12_spill]] %s1454_s21  ;;  %s1554_s10 = sadd.s32 4294967295, %s1458_s22   ;;  %s1458_s22 = sphi %s1539_s22, %s1826_s22   ;;  %s1454_s21 = sphi %s1537_s21, %s1828_s21   ;;  %s1450_s20 = sphi %s1535_s20, %s1830_s20   ;;  %s1446_s19 = sphi %s1533_s19, %s1829_s19  }
   0x9   : > { %s1088_s23 = sadd.s32 4294967294, %s1458_s22   ;;  %s1558_s24 = sadd.s32 1, %s1458_s22  }
   0xa   : > { %1811 = sst [smem:[#allocation13_spill]] %s1558_s24  ;;  %s276_s25 = sadd.s32 1, %s1454_s21 }
   0xb   : > { %s273_s26 = ssub.s32 %s1458_s22, %s1558_s24  ;;  %p286_p0 = scmp.ne.s32.totalorder %s1454_s21, %s1450_s20 }
   0xc   : > { %p274_p1 = scmp.eq.s32.totalorder %s273_s26, 0  ;;  %p287_p2 = scmp.eq.s32.totalorder %s1554_s10, 1 }
   0xd   : > { %p292_p3 = scmp.ne.s32.totalorder %s1450_s20, %s1446_s19  ;;  %p293_p4 = scmp.eq.s32.totalorder %s1088_s23, 1 }
   0xe   : > { %s1569_s27 = scalar_select %p274_p1, %s1454_s21, %s276_s25  }
   0xf   : > { %p1571_p5 = por %p287_p2, %p286_p0  ;;  %p1575_p6 = por %p293_p4, %p292_p3 }
  0x10   : > { %1812 = sst [smem:[#allocation14_spill]] %s1569_s27  ;;  %p1089_p7 = scmp.ge.s32.totalorder %s1458_s22, 1 }
  0x11   : > { %s1813_s28 = scalar_select %p1571_p5, 1, 0 }
  0x12   : > { %s1814_s29 = scalar_select %p1575_p6, 1, 0 }
  0x13   : > { %p300_p8 = scmp.lt.s32.totalorder %s1458_s22, 3  ;;  %p1803_p9 = scmp.eq.s32.totalorder %s1554_s10, 0 }
  0x14   : > { %1815 = sst [smem:[#allocation15_spill]] %s1814_s29  ;;  %s1460_s12 = smov [#allocation3]  }
  0x15   : > { %p1582_p10 = pnand %p1089_p7, %p300_p8  ;;  %s330_s13 = sshll.u32 %s1460_s12, 4  ;;  %s331_s13 = int_to_ptr.vmem [resolvable:$true] %s330_s13 }
  0x16   : > { %s1461_s15 = smov [#allocation6]   ;;  %s1332_s23 = scalar_lea.hbm %s1799_s8, 8192 }
  0x17   : > { %s1816_s30 = scalar_select %p1582_p10, 1, 0 }
  0x18   : > { %p1253_p11 = pneg %p1582_p10  ;;  %s343_s16 = sshll.u32 %s1461_s15, 4  ;;  %s1594_s16 = int_to_ptr.vmem [resolvable:$true] %s343_s16 }
  0x19   : > { %p1333_p13 = scmp.ne.s32.totalorder %s1799_s8, %s1332_s23  ;;  %p1339_p3 = scmp.lt.u32.totalorder %s1332_s23, %s1799_s8 }
  0x1a   : > { %p1590_p12 = pnand %p1803_p9, %p1253_p11 }
  0x1c   : > { %p1334_p0 = pneg %p1590_p12 }
  0x1e   : > { %p1335_p1 = pnand %p1334_p0, %p1333_p13 }
  0x20   : > { %p1336_p2 = pneg %p1335_p1 }
  0x22   : > { %p1341_p4 = pnand %p1339_p3, %p1336_p2 }
  0x24   : > { %1344 = shalt.err (!%p1341_p4)
}
  0x25   : > { %s1345_s15 = scalar_lea.vmem %s331_s13, 8192  ;;  %p1353_p9 = scmp.lt.s32.totalorder %s331_s13, %s331_s13 }
  0x26   : > { %p1346_p7 = scmp.ne.s32.totalorder %s331_s13, %s1345_s15  ;;  %p1354_p6 = scmp.lt.s32.totalorder %s1345_s15, %s1345_s15 }
  0x28   : > { %p1348_p8 = pnand %p1346_p7, %p1334_p0  ;;  %p1355_p5 = por %p1354_p6, %p1353_p9 }
  0x2a   : > { %p1349_p11 = pneg %p1348_p8 }
  0x2c   : > { %p1356_p10 = pnand %p1355_p5, %p1349_p11 }
  0x2e   : > { %1359 = shalt.err (!%p1356_p10)
}
  0x2f   : > { %s1462_s17 = smov 256   ;;  %s1463_s18 = smov 16  }
  0x30   : > { %1256 = dma.hbm_to_vmem [thread:$0]  (!%p1590_p12), %s1799_s8, 8192, %s331_s13, [#allocation4], %s1462_s17, %s1462_s17, %s1463_s18  }
  0x31   : > { %s1360_s12 = scalar_lea.hbm %s1800_s9, 8192 }
  0x32   : > { %p1361_p13 = scmp.ne.s32.totalorder %s1800_s9, %s1360_s12  ;;  %p1367_p9 = scmp.lt.u32.totalorder %s1360_s12, %s1800_s9 }
  0x34   : > { %p1363_p5 = pnand %p1361_p13, %p1334_p0 }
  0x36   : > { %p1364_p6 = pneg %p1363_p5 }
  0x38   : > { %p1369_p10 = pnand %p1367_p9, %p1364_p6 }
  0x3a   : > { %1372 = shalt.err (!%p1369_p10)
}
  0x3b   : > { %s1373_s13 = scalar_lea.vmem %s1594_s16, 8192  ;;  %p1381_p4 = scmp.lt.s32.totalorder %s1594_s16, %s1594_s16 }
  0x3c   : > { %p1374_p1 = scmp.ne.s32.totalorder %s1594_s16, %s1373_s13  ;;  %p1382_p7 = scmp.lt.s32.totalorder %s1373_s13, %s1373_s13 }
  0x3e   : > { %p1376_p2 = pnand %p1374_p1, %p1334_p0  ;;  %p1383_p8 = por %p1382_p7, %p1381_p4 }
  0x40   : > { %p1377_p3 = pneg %p1376_p2 }
  0x42   : > { %p1384_p11 = pnand %p1383_p8, %p1377_p3 }
  0x44   : > { %1387 = shalt.err (!%p1384_p11)
}
  0x45   : > { %1259 = dma.hbm_to_vmem [thread:$0]  (!%p1590_p12), %s1800_s9, 8192, %s1594_s16, [#allocation7], %s1462_s17, %s1462_s17, %s1463_s18  }
  0x46   : > { %p1818_p13 = scmp.ne.s32.totalorder %s1816_s30, 0 }
  0x47   : > { %p1819_p5 = scmp.eq.s32.totalorder (!%p1818_p13), %s1554_s10, 0 }
  0x48   : > { %378 = sbr.rel (%p1818_p13) target bundleno = 724 (0x2d4), region = 64 }
  0x4f   : > { %1433 = dma.done.wait (%p1819_p5), [#allocation4], 8192   ;;  %p1820_p0 = pmov %p1819_p5 }
  0x51   : > { %1435 = vsyncadd (%p1820_p0), [#allocation4], 4294959104  ;;  %p1821_p6 = pmov %p1820_p0 }
  0x52   : > { %p1822_p9 = pmov %p1820_p0 }
  0x53   : > { %1437 = dma.done.wait (%p1821_p6), [#allocation7], 8192  }
  0x54   : > { %1439 = vsyncadd (%p1822_p9), [#allocation7], 4294959104  ;;  %v1464_v1 = vmov 1   ;;  %v1465_v2 = vmov 0   ;;  %v442_v3 = vld [vmem:[%s1793_s2] sm:$0xff]  ;;  %v443_v4 = vld [vmem:[%s1793_s2 + $0x8] sm:$0xff] }
  0x55   : > { %1311 = vset.pattern.permute.xlu1 %v1464_v1  ;;  %1310 = vset.pattern.permute.xlu0 %v1465_v2  ;;  %v1466_v5 = vmov 2   ;;  %p427_p12 = scmp.lt.s32.totalorder %s1554_s10, 1  ;;  %v545_v6 = vld [vmem:[%s1794_s3] sm:$0xff]  ;;  %v546_v7 = vld [vmem:[%s1794_s3 + $0x8] sm:$0xff]  ;;  %v720_v18 = vld [vmem:[#allocation6 + $0x10] sm:$0xff]  ;;  %vm581_vm0 = vcmask 15360  }
  0x56   : > { %478 = vperm.xlu1 %1311, %v442_v3   ;;  %446 = vperm.xlu0 %1310, %v442_v3   ;;  %v719_v10 = vld [vmem:[#allocation6 + $0x8] sm:$0xff]  ;;  %v721_v11 = vld [vmem:[#allocation6 + $0x18] sm:$0xff]  ;;  %v718_v17 = vld [vmem:[#allocation6] sm:$0xff]  ;;  %s1112_s18 = sshll.u32 %s1554_s10, 9  ;;  %p1823_p1 = scmp.ne.s32.totalorder %s1813_s28, 0 }
  0x57   : > { %s1667_s25 = scalar_select %p427_p12, %s1554_s10, 1  ;;  %v655_v12 = vld [vmem:[#allocation3 + $0x8] sm:$0xff]  ;;  %v1113_v15 = vpack.c.bf16 %v721_v11, %v719_v10  ;;  %v657_v16 = vld [vmem:[#allocation3 + $0x18] sm:$0xff]  ;;  %v1115_v20 = vpack.c.bf16 %v720_v18, %v718_v17  ;;  %v654_v21 = vld [vmem:[#allocation3] sm:$0xff] }
  0x58   : > { %v1177_v19 = vpack.c.bf16 %v657_v16, %v655_v12  ;;  %v656_v22 = vld [vmem:[#allocation3 + $0x10] sm:$0xff]  ;;  %v723_v23 = vld [vmem:[#allocation6 + $0x28] sm:$0xff]  ;;  %v725_v27 = vld [vmem:[#allocation6 + $0x38] sm:$0xff]  ;;  %s1748_s23 = scalar_lea.hbm %s1802_s11, %s1112_s18  ;;  %s1467_s12 = smov [#allocation8]  }
  0x59   : > { %s1110_s26 = sshll.u32 %s1667_s25, 5  ;;  %1114 = vmatprep.subr.bf16.mxu1 %v1113_v15  ;;  %v1179_v26 = vpack.c.bf16 %v656_v22, %v654_v21  ;;  %v659_v28 = vld [vmem:[#allocation3 + $0x28] sm:$0xff]  ;;  %v661_v29 = vld [vmem:[#allocation3 + $0x38] sm:$0xff]  ;;  %v1117_v30 = vpack.c.bf16 %v725_v27, %v723_v23  ;;  %v722_v32 = vld [vmem:[#allocation6 + $0x20] sm:$0xff]  ;;  %s1111_s21 = sshll.u32 %s1667_s25, 3 }
  0x5a   : > { %482 = vperm.xlu1 %1311, %v443_v4   ;;  %451 = vperm.xlu0 %1310, %v443_v4   ;;  %s1673_s13 = scalar_lea.vmem %s1791_s0, %s1110_s26  ;;  %v1181_v31 = vpack.c.bf16 %v661_v29, %v659_v28  ;;  %v724_v33 = vld [vmem:[#allocation6 + $0x30] sm:$0xff]  ;;  %v658_v34 = vld [vmem:[#allocation3 + $0x20] sm:$0xff]  ;;  %v727_v38 = vld [vmem:[#allocation6 + $0x48] sm:$0xff]  ;;  %s436_s30 = scalar_lea.vmem %s1792_s1, %s1111_s21 }
  0x5b   : > { %v1676_v8 = vld [vmem:[%s1673_s13 + $0x18] sm:$0xff]  ;;  %v1679_v9 = vld [vmem:[%s1673_s13 + $0x8] sm:$0xff]  ;;  %1178 = vmatprep.subr.bf16.mxu0 %v1177_v19  ;;  %1116 = vmatpush1.bf16.msra.mxu1 %v1115_v20  ;;  %v1119_v36 = vpack.c.bf16 %v724_v33, %v722_v32  ;;  %s1392_s15 = sshll.u32 %s1467_s12, 4  ;;  %s1393_s15 = int_to_ptr.vmem [resolvable:$false] %s1392_s15 }
  0x5c   : > { %v645_v13 = vadd.f32 %v1676_v8, %v1679_v9  ;;  %v631_v14 = vmax.f32 %v1679_v9, %v1676_v8  ;;  %1180 = vmatpush1.bf16.msra.mxu0 %v1179_v26  ;;  %v660_v37 = vld [vmem:[#allocation3 + $0x30] sm:$0xff]  ;;  %v729_v39 = vld [vmem:[#allocation6 + $0x58] sm:$0xff]  ;;  %1118 = vmatprep.subr.bf16.mxu1 %v1117_v30  ;;  %v663_v43 = vld [vmem:[#allocation3 + $0x48] sm:$0xff] }
  0x5d   : > { %1182 = vmatprep.subr.bf16.mxu0 %v1181_v31  ;;  %v1183_v41 = vpack.c.bf16 %v660_v37, %v658_v34  ;;  %v1121_v42 = vpack.c.bf16 %v729_v39, %v727_v38  ;;  %v665_v44 = vld [vmem:[#allocation3 + $0x58] sm:$0xff]  ;;  %v726_v45 = vld [vmem:[#allocation6 + $0x40] sm:$0xff]  ;;  %v728_v48 = vld [vmem:[#allocation6 + $0x50] sm:$0xff] }
  0x5e   : > { %1313 = vset.pattern.permute.xlu1 %v1466_v5  ;;  %1312 = vset.pattern.permute.xlu0 %v1466_v5  ;;  %v646_v24 = vrot.slane %v645_v13, 4  ;;  %v632_v25 = vrot.slane %v631_v14, 4  ;;  %v1185_v47 = vpack.c.bf16 %v665_v44, %v663_v43  ;;  %v662_v49 = vld [vmem:[#allocation3 + $0x40] sm:$0xff]  ;;  %v664_v50 = vld [vmem:[#allocation3 + $0x50] sm:$0xff]  ;;  %v1123_v52 = vpack.c.bf16 %v728_v48, %v726_v45  ;;  %v731_v53 = vld [vmem:[#allocation6 + $0x68] sm:$0xff] }
  0x5f   : > { %516 = vperm.xlu1 %1313, %v443_v4   ;;  %512 = vperm.xlu0 %1312, %v442_v3   ;;  %v733_v54 = vld [vmem:[#allocation6 + $0x78] sm:$0xff]  ;;  %v667_v55 = vld [vmem:[#allocation3 + $0x68] sm:$0xff]  ;;  %v1187_v57 = vpack.c.bf16 %v664_v50, %v662_v49  ;;  %v730_v60 = vld [vmem:[#allocation6 + $0x60] sm:$0xff] }
  0x60   : > { %v647_v35 = vadd.f32 %v646_v24, %v645_v13  ;;  %v633_v40 = vmax.f32 %v631_v14, %v632_v25  ;;  %1120 = vmatpush1.bf16.msra.mxu1 %v1119_v36  ;;  %1184 = vmatpush1.bf16.msra.mxu0 %v1183_v41  ;;  %v1125_v58 = vpack.c.bf16 %v733_v54, %v731_v53  ;;  %v669_v59 = vld [vmem:[#allocation3 + $0x78] sm:$0xff]  ;;  %v732_v61 = vld [vmem:[#allocation6 + $0x70] sm:$0xff]  ;;  %v666_v0 = vld [vmem:[#allocation3 + $0x60] sm:$0xff] }
  0x61   : > { %1122 = vmatprep.subr.bf16.mxu1 %v1121_v42  ;;  %1186 = vmatprep.subr.bf16.mxu0 %v1185_v47  ;;  %v1189_v63 = vpack.c.bf16 %v669_v59, %v667_v55  ;;  %v668_v1 = vld [vmem:[#allocation3 + $0x70] sm:$0xff]  ;;  %v737_v4 = vld [vmem:[#allocation6 + $0x98] sm:$0xff]  ;;  %v671_v5 = vld [vmem:[#allocation3 + $0x88] sm:$0xff]  ;;  %v1127_v10 = vpack.c.bf16 %v732_v61, %v730_v60 }
  0x62   : > { %v648_v46 = vrot.slane %v647_v35, 2  ;;  %v634_v51 = vrot.slane %v633_v40, 2  ;;  %v1191_v12 = vpack.c.bf16 %v668_v1, %v666_v0  ;;  %v734_v14 = vld [vmem:[#allocation6 + $0x80] sm:$0xff]  ;;  %v736_v15 = vld [vmem:[#allocation6 + $0x90] sm:$0xff]  ;;  %v739_v20 = vld [vmem:[#allocation6 + $0xa8] sm:$0xff] }
  0x63   : > { %1314 = vset.pattern.permute.xlu1 %v1465_v2  ;;  %1315 = vset.pattern.permute.xlu0 %v1465_v2  ;;  %v735_v2 = vld [vmem:[#allocation6 + $0x88] sm:$0xff]  ;;  %v670_v16 = vld [vmem:[#allocation3 + $0x80] sm:$0xff]  ;;  %v672_v19 = vld [vmem:[#allocation3 + $0x90] sm:$0xff]  ;;  %v1131_v25 = vpack.c.bf16 %v736_v15, %v734_v14 }
  0x64   : > { %549 = vperm.xlu1 %1314, %v545_v6   ;;  %554 = vperm.xlu0 %1315, %v546_v7   ;;  %v649_v56 = vadd.f32 %v648_v46, %v647_v35  ;;  %v635_v62 = vmax.f32 %v633_v40, %v634_v51  ;;  %v673_v6 = vld [vmem:[#allocation3 + $0x98] sm:$0xff]  ;;  %v1129_v13 = vpack.c.bf16 %v737_v4, %v735_v2  ;;  %v675_v23 = vld [vmem:[#allocation3 + $0xa8] sm:$0xff]  ;;  %v738_v28 = vld [vmem:[#allocation6 + $0xa0] sm:$0xff] }
  0x65   : > { %1124 = vmatpush1.bf16.msra.mxu1 %v1123_v52  ;;  %1188 = vmatpush1.bf16.msra.mxu0 %v1187_v57  ;;  %v1193_v18 = vpack.c.bf16 %v673_v6, %v671_v5  ;;  %v741_v21 = vld [vmem:[#allocation6 + $0xb8] sm:$0xff]  ;;  %v1195_v26 = vpack.c.bf16 %v672_v19, %v670_v16  ;;  %v740_v29 = vld [vmem:[#allocation6 + $0xb0] sm:$0xff]  ;;  %v674_v30 = vld [vmem:[#allocation3 + $0xa0] sm:$0xff] }
  0x66   : > { %v650_v3 = vrot.slane %v649_v56, 1  ;;  %v636_v7 = vrot.slane %v635_v62, 1  ;;  %1126 = vmatprep.subr.bf16.mxu1 %v1125_v58  ;;  %1190 = vmatprep.subr.bf16.mxu0 %v1189_v63  ;;  %v677_v24 = vld [vmem:[#allocation3 + $0xb8] sm:$0xff]  ;;  %v1133_v27 = vpack.c.bf16 %v741_v21, %v739_v20  ;;  %v676_v32 = vld [vmem:[#allocation3 + $0xb0] sm:$0xff]  ;;  %v743_v33 = vld [vmem:[#allocation6 + $0xc8] sm:$0xff]  ;;  %v1135_v37 = vpack.c.bf16 %v740_v29, %v738_v28 }
  0x67   : > { %v1197_v31 = vpack.c.bf16 %v677_v24, %v675_v23  ;;  %v745_v34 = vld [vmem:[#allocation6 + $0xd8] sm:$0xff]  ;;  %v679_v35 = vld [vmem:[#allocation3 + $0xc8] sm:$0xff]  ;;  %v1199_v38 = vpack.c.bf16 %v676_v32, %v674_v30  ;;  %v742_v40 = vld [vmem:[#allocation6 + $0xc0] sm:$0xff] }
  0x68   : > { %v651_v11 = vadd.f32 %v650_v3, %v649_v56  ;;  %v637_v17 = vmax.f32 %v635_v62, %v636_v7  ;;  %v681_v36 = vld [vmem:[#allocation3 + $0xd8] sm:$0xff]  ;;  %v1137_v39 = vpack.c.bf16 %v745_v34, %v743_v33  ;;  %v744_v41 = vld [vmem:[#allocation6 + $0xd0] sm:$0xff]  ;;  %v678_v42 = vld [vmem:[#allocation3 + $0xc0] sm:$0xff] }
  0x69   : > { %1128 = vmatpush1.bf16.msra.mxu1 %v1127_v10  ;;  %1192 = vmatpush1.bf16.msra.mxu0 %v1191_v12  ;;  %v1201_v43 = vpack.c.bf16 %v681_v36, %v679_v35  ;;  %v680_v44 = vld [vmem:[#allocation3 + $0xd0] sm:$0xff]  ;;  %v747_v45 = vld [vmem:[#allocation6 + $0xe8] sm:$0xff]  ;;  %v749_v46 = vld [vmem:[#allocation6 + $0xf8] sm:$0xff]  ;;  %v1139_v49 = vpack.c.bf16 %v744_v41, %v742_v40 }
  0x6a   : > { %v653_v22 = vmul.f32 0.0625, %v651_v11  ;;  %917 = vmatprep.mubr.f32.mxu0 %v637_v17  ;;  %1130 = vmatprep.subr.bf16.mxu1 %v1129_v13  ;;  %v683_v47 = vld [vmem:[#allocation3 + $0xe8] sm:$0xff]  ;;  %v685_v48 = vld [vmem:[#allocation3 + $0xf8] sm:$0xff]  ;;  %v1203_v50 = vpack.c.bf16 %v680_v44, %v678_v42  ;;  %v1141_v51 = vpack.c.bf16 %v749_v46, %v747_v45  ;;  %v746_v52 = vld [vmem:[#allocation6 + $0xe0] sm:$0xff] }
  0x6b   : > { %1194 = vmatprep.subr.bf16.mxu0 %v1193_v18  ;;  %v748_v53 = vld [vmem:[#allocation6 + $0xf0] sm:$0xff]  ;;  %v682_v54 = vld [vmem:[#allocation3 + $0xe0] sm:$0xff]  ;;  %v1205_v55 = vpack.c.bf16 %v685_v48, %v683_v47  ;;  %v751_v57 = vld [vmem:[#allocation6 + $0x108] sm:$0xff] }
  0x6c   : > { %846 = vmatprep.mubr.f32.mxu1 %v653_v22  ;;  %v684_v56 = vld [vmem:[#allocation3 + $0xf0] sm:$0xff]  ;;  %v753_v58 = vld [vmem:[#allocation6 + $0x118] sm:$0xff]  ;;  %v687_v59 = vld [vmem:[#allocation3 + $0x108] sm:$0xff]  ;;  %v1143_v61 = vpack.c.bf16 %v748_v53, %v746_v52 }
  0x6d   : > { %1132 = vmatpush1.bf16.msra.mxu1 %v1131_v25  ;;  %1196 = vmatpush1.bf16.msra.mxu0 %v1195_v26  ;;  %v689_v60 = vld [vmem:[#allocation3 + $0x118] sm:$0xff]  ;;  %v1207_v62 = vpack.c.bf16 %v684_v56, %v682_v54  ;;  %v1145_v63 = vpack.c.bf16 %v753_v58, %v751_v57  ;;  %v750_v0 = vld [vmem:[#allocation6 + $0x100] sm:$0xff]  ;;  %v752_v1 = vld [vmem:[#allocation6 + $0x110] sm:$0xff] }
  0x6e   : > { %1134 = vmatprep.subr.bf16.mxu1 %v1133_v27  ;;  %1198 = vmatprep.subr.bf16.mxu0 %v1197_v31  ;;  %v686_v2 = vld [vmem:[#allocation3 + $0x100] sm:$0xff]  ;;  %v1209_v3 = vpack.c.bf16 %v689_v60, %v687_v59  ;;  %v688_v4 = vld [vmem:[#allocation3 + $0x110] sm:$0xff]  ;;  %v755_v5 = vld [vmem:[#allocation6 + $0x128] sm:$0xff]  ;;  %v1147_v13 = vpack.c.bf16 %v752_v1, %v750_v0 }
  0x6f   : > { %v757_v6 = vld [vmem:[#allocation6 + $0x138] sm:$0xff]  ;;  %v691_v7 = vld [vmem:[#allocation3 + $0x128] sm:$0xff]  ;;  %v1211_v14 = vpack.c.bf16 %v688_v4, %v686_v2  ;;  %v754_v16 = vld [vmem:[#allocation6 + $0x120] sm:$0xff] }
  0x70   : > { %v693_v10 = vld [vmem:[#allocation3 + $0x138] sm:$0xff]  ;;  %v1686_v11 = vld [vmem:[%s1673_s13 + $0x10] sm:$0xff]  ;;  %v1149_v15 = vpack.c.bf16 %v757_v6, %v755_v5  ;;  %v690_v18 = vld [vmem:[#allocation3 + $0x120] sm:$0xff] }
  0x71   : > { %1136 = vmatpush1.bf16.msra.mxu1 %v1135_v37  ;;  %1200 = vmatpush1.bf16.msra.mxu0 %v1199_v38  ;;  %v1689_v12 = vld [vmem:[%s1673_s13] sm:$0xff]  ;;  %v756_v17 = vld [vmem:[#allocation6 + $0x130] sm:$0xff]  ;;  %v1213_v19 = vpack.c.bf16 %v693_v10, %v691_v7  ;;  %v759_v21 = vld [vmem:[#allocation6 + $0x148] sm:$0xff]  ;;  %s1394_s13 = scalar_lea.vmem %s1393_s15, 1024 }
  0x72   : > { %1138 = vmatprep.subr.bf16.mxu1 %v1137_v39  ;;  %1202 = vmatprep.subr.bf16.mxu0 %v1201_v43  ;;  %v692_v20 = vld [vmem:[#allocation3 + $0x130] sm:$0xff]  ;;  %v761_v22 = vld [vmem:[#allocation6 + $0x158] sm:$0xff]  ;;  %v695_v23 = vld [vmem:[#allocation3 + $0x148] sm:$0xff]  ;;  %v638_v25 = vadd.f32 %v1686_v11, %v1689_v12  ;;  %v1151_v26 = vpack.c.bf16 %v756_v17, %v754_v16  ;;  %v624_v40 = vmax.f32 %v1689_v12, %v1686_v11 }
  0x73   : > { %v697_v24 = vld [vmem:[#allocation3 + $0x158] sm:$0xff]  ;;  %v1215_v27 = vpack.c.bf16 %v692_v20, %v690_v18  ;;  %v1153_v28 = vpack.c.bf16 %v761_v22, %v759_v21  ;;  %v758_v29 = vld [vmem:[#allocation6 + $0x140] sm:$0xff]  ;;  %v760_v30 = vld [vmem:[#allocation6 + $0x150] sm:$0xff] }
  0x74   : > { %v694_v31 = vld [vmem:[#allocation3 + $0x140] sm:$0xff]  ;;  %v1217_v32 = vpack.c.bf16 %v697_v24, %v695_v23  ;;  %v696_v33 = vld [vmem:[#allocation3 + $0x150] sm:$0xff]  ;;  %v763_v34 = vld [vmem:[#allocation6 + $0x168] sm:$0xff]  ;;  %v639_v38 = vrot.slane %v638_v25, 4  ;;  %v1155_v39 = vpack.c.bf16 %v760_v30, %v758_v29  ;;  %v625_v54 = vrot.slane %v624_v40, 4 }
  0x75   : > { %1140 = vmatpush1.bf16.msra.mxu1 %v1139_v49  ;;  %1204 = vmatpush1.bf16.msra.mxu0 %v1203_v50  ;;  %v765_v35 = vld [vmem:[#allocation6 + $0x178] sm:$0xff]  ;;  %v699_v36 = vld [vmem:[#allocation3 + $0x168] sm:$0xff]  ;;  %v1219_v41 = vpack.c.bf16 %v696_v33, %v694_v31  ;;  %v762_v43 = vld [vmem:[#allocation6 + $0x160] sm:$0xff] }
  0x76   : > { %1142 = vmatprep.subr.bf16.mxu1 %v1141_v51  ;;  %1206 = vmatprep.subr.bf16.mxu0 %v1205_v55  ;;  %v701_v37 = vld [vmem:[#allocation3 + $0x178] sm:$0xff]  ;;  %v1157_v42 = vpack.c.bf16 %v765_v35, %v763_v34  ;;  %v764_v44 = vld [vmem:[#allocation6 + $0x170] sm:$0xff]  ;;  %v698_v45 = vld [vmem:[#allocation3 + $0x160] sm:$0xff]  ;;  %v640_v52 = vadd.f32 %v639_v38, %v638_v25  ;;  %v626_v4 = vmax.f32 %v624_v40, %v625_v54 }
  0x77   : > { %v1221_v46 = vpack.c.bf16 %v701_v37, %v699_v36  ;;  %v700_v47 = vld [vmem:[#allocation3 + $0x170] sm:$0xff]  ;;  %v767_v48 = vld [vmem:[#allocation6 + $0x188] sm:$0xff]  ;;  %v769_v49 = vld [vmem:[#allocation6 + $0x198] sm:$0xff]  ;;  %v1159_v53 = vpack.c.bf16 %v764_v44, %v762_v43 }
  0x78   : > { %v703_v50 = vld [vmem:[#allocation3 + $0x188] sm:$0xff]  ;;  %v705_v51 = vld [vmem:[#allocation3 + $0x198] sm:$0xff]  ;;  %v1223_v55 = vpack.c.bf16 %v700_v47, %v698_v45  ;;  %v1161_v56 = vpack.c.bf16 %v769_v49, %v767_v48  ;;  %v766_v57 = vld [vmem:[#allocation6 + $0x180] sm:$0xff]  ;;  %v641_v2 = vrot.slane %v640_v52, 2  ;;  %v627_v22 = vrot.slane %v626_v4, 2 }
  0x79   : > { %1144 = vmatpush1.bf16.msra.mxu1 %v1143_v61  ;;  %1208 = vmatpush1.bf16.msra.mxu0 %v1207_v62  ;;  %v768_v58 = vld [vmem:[#allocation6 + $0x190] sm:$0xff]  ;;  %v702_v59 = vld [vmem:[#allocation3 + $0x180] sm:$0xff]  ;;  %v1225_v60 = vpack.c.bf16 %v705_v51, %v703_v50  ;;  %v771_v62 = vld [vmem:[#allocation6 + $0x1a8] sm:$0xff]  ;;  %v455_v50 = vlaneseq }
  0x7a   : > { %1146 = vmatprep.subr.bf16.mxu1 %v1145_v63  ;;  %1210 = vmatprep.subr.bf16.mxu0 %v1209_v3  ;;  %v704_v61 = vld [vmem:[#allocation3 + $0x190] sm:$0xff]  ;;  %v773_v63 = vld [vmem:[#allocation6 + $0x1b8] sm:$0xff]  ;;  %v707_v0 = vld [vmem:[#allocation3 + $0x1a8] sm:$0xff]  ;;  %v1163_v3 = vpack.c.bf16 %v768_v58, %v766_v57  ;;  %v642_v20 = vadd.f32 %v641_v2, %v640_v52  ;;  %v628_v36 = vmax.f32 %v626_v4, %v627_v22 }
  0x7b   : > { %v709_v1 = vld [vmem:[#allocation3 + $0x1b8] sm:$0xff]  ;;  %v1227_v5 = vpack.c.bf16 %v704_v61, %v702_v59  ;;  %v1165_v6 = vpack.c.bf16 %v773_v63, %v771_v62  ;;  %v770_v7 = vld [vmem:[#allocation6 + $0x1a0] sm:$0xff]  ;;  %v772_v10 = vld [vmem:[#allocation6 + $0x1b0] sm:$0xff]  ;;  %v456_v51 = vshrl.u32 %v455_v50, 7 }
  0x7c   : > { %v775_v16 = vld [vmem:[#allocation6 + $0x1c8] sm:$0xff]  ;;  %v777_v17 = vld [vmem:[#allocation6 + $0x1d8] sm:$0xff]  ;;  %v1167_v21 = vpack.c.bf16 %v772_v10, %v770_v7  ;;  %v774_v25 = vld [vmem:[#allocation6 + $0x1c0] sm:$0xff]  ;;  %v643_v34 = vrot.slane %v642_v20, 1 }
  0x7d   : > { %1148 = vmatpush1.bf16.msra.mxu1 %v1147_v13  ;;  %1212 = vmatpush1.bf16.msra.mxu0 %v1211_v14  ;;  %v706_v13 = vld [vmem:[#allocation3 + $0x1a0] sm:$0xff]  ;;  %v1229_v14 = vpack.c.bf16 %v709_v1, %v707_v0  ;;  %v711_v18 = vld [vmem:[#allocation3 + $0x1c8] sm:$0xff]  ;;  %v1169_v24 = vpack.c.bf16 %v777_v17, %v775_v16  ;;  %v712_v29 = vld [vmem:[#allocation3 + $0x1d0] sm:$0xff]  ;;  %v487_v52 = vsub.s32 1, %v456_v51  ;;  %v1699_v54 = vsub.s32 0, %v456_v51 }
  0x7e   : > { %1150 = vmatprep.subr.bf16.mxu1 %v1149_v15  ;;  %1214 = vmatprep.subr.bf16.mxu0 %v1213_v19  ;;  %v708_v15 = vld [vmem:[#allocation3 + $0x1b0] sm:$0xff]  ;;  %v713_v19 = vld [vmem:[#allocation3 + $0x1d8] sm:$0xff]  ;;  %v779_v30 = vld [vmem:[#allocation6 + $0x1e8] sm:$0xff]  ;;  %v644_v44 = vadd.f32 %v643_v34, %v642_v20  ;;  %v521_v61 = vsub.s32 2, %v456_v51  ;;  %v525_v62 = vsub.s32 6, %v456_v51 }
  0x7f   : > { %v1231_v23 = vpack.c.bf16 %v708_v15, %v706_v13  ;;  %v781_v31 = vld [vmem:[#allocation6 + $0x1f8] sm:$0xff]  ;;  %v780_v40 = vld [vmem:[#allocation6 + $0x1f0] sm:$0xff] }
  0x80   : > { %v717_v33 = vld [vmem:[#allocation3 + $0x1f8] sm:$0xff]  ;;  %v1173_v38 = vpack.c.bf16 %v781_v31, %v779_v30  ;;  %v716_v43 = vld [vmem:[#allocation3 + $0x1f0] sm:$0xff]  ;;  %v652_v48 = vmul.f32 0.0625, %v644_v44 }
  0x81   : > { %1152 = vmatpush1.bf16.msra.mxu1 %v1151_v26  ;;  %1216 = vmatpush1.bf16.msra.mxu0 %v1215_v27  ;;  %v776_v26 = vld [vmem:[#allocation6 + $0x1d0] sm:$0xff]  ;;  %v710_v27 = vld [vmem:[#allocation3 + $0x1c0] sm:$0xff] }
  0x82   : > { %1154 = vmatprep.subr.bf16.mxu1 %v1153_v28  ;;  %1218 = vmatprep.subr.bf16.mxu0 %v1217_v32  ;;  %v1233_v28 = vpack.c.bf16 %v713_v19, %v711_v18  ;;  %v715_v32 = vld [vmem:[#allocation3 + $0x1e8] sm:$0xff]  ;;  %v1171_v35 = vpack.c.bf16 %v776_v26, %v774_v25  ;;  %v1235_v37 = vpack.c.bf16 %v712_v29, %v710_v27 }
  0x85   : > { %1156 = vmatpush1.bf16.msra.mxu1 %v1155_v39  ;;  %1220 = vmatpush1.bf16.msra.mxu0 %v1219_v41  ;;  %v778_v39 = vld [vmem:[#allocation6 + $0x1e0] sm:$0xff]  ;;  %v1237_v41 = vpack.c.bf16 %v717_v33, %v715_v32 }
  0x86   : > { %1158 = vmatprep.subr.bf16.mxu1 %v1157_v42  ;;  %1222 = vmatprep.subr.bf16.mxu0 %v1221_v46  ;;  %v714_v42 = vld [vmem:[#allocation3 + $0x1e0] sm:$0xff]  ;;  %v1175_v45 = vpack.c.bf16 %v780_v40, %v778_v39  ;;  %v629_v46 = vrot.slane %v628_v36, 1 }
  0x87   : > { %v1239_v47 = vpack.c.bf16 %v716_v43, %v714_v42 }
  0x88   : > { %v630_v49 = vmax.f32 %v628_v36, %v629_v46 }
  0x89   : > { %1160 = vmatpush1.bf16.msra.mxu1 %v1159_v53  ;;  %1224 = vmatpush1.bf16.msra.mxu0 %v1223_v55  ;;  %v491_v53 = vsub.s32 5, %v456_v51  ;;  %v461_v55 = vsub.s32 4, %v456_v51 }
  0x8a   : > { %1162 = vmatprep.subr.bf16.mxu1 %v1161_v56  ;;  %1226 = vmatprep.subr.bf16.mxu0 %v1225_v60  ;;  %v441_v56 = vld [vmem:[%s436_s30] sm:$0x77]  ;;  %s424_s30 = sand.u32 1, %s1450_s20  }
  0x8b   : > { %v488_v57 = vrot.slane %v441_v56, %v487_v52  ;;  %v492_v58 = vrot.slane %v441_v56, %v491_v53  ;;  %v458_v59 = vrot.slane %v441_v56, %v1699_v54  ;;  %v462_v60 = vrot.slane %v441_v56, %v461_v55  ;;  %v578_v53 = vld [vmem:[%s1795_s4 + $0x8] sm:$0xff]  ;;  %s1096_s14 = sshll.u32 %s424_s30, 5  ;;  %s1750_s25 = scalar_lea.sflag [#allocation5], %s424_s30 }
  0x8c   : > { %s426_s16 = scalar_lea.vmem [#allocation8], %s1096_s14 }
  0x8d   : > { %1164 = vmatpush1.bf16.msra.mxu1 %v1163_v3  ;;  %1228 = vmatpush1.bf16.msra.mxu0 %v1227_v5  ;;  %v498_v0 = vrot.slane %v488_v57, %v487_v52  ;;  %v502_v1 = vrot.slane %v492_v58, %v487_v52  ;;  %v468_v3 = vrot.slane %v458_v59, %v1699_v54  ;;  %s992_s17 = sshll.u32 %s426_s16, 4  ;;  %s1743_s17 = int_to_ptr.vmem [resolvable:$true] %s992_s17 }
  0x8e   : > { %1166 = vmatprep.subr.bf16.mxu1 %v1165_v6  ;;  %1230 = vmatprep.subr.bf16.mxu0 %v1229_v14  ;;  %v472_v4 = vrot.slane %v462_v60, %v1699_v54  ;;  %v522_v5 = vrot.slane %v441_v56, %v521_v61  ;;  %v526_v6 = vrot.slane %v441_v56, %v525_v62  ;;  %v577_v56 = vld [vmem:[%s1795_s4] sm:$0xff]  ;;  %s1388_s26 = scalar_lea.vmem %s1743_s17, 512  ;;  %p1395_p4 = scmp.lt.s32.totalorder %s1743_s17, %s1393_s15 }
  0x8f   : > { %p1389_p10 = scmp.ne.s32.totalorder %s1743_s17, %s1388_s26  ;;  %p1396_p7 = scmp.lt.s32.totalorder %s1394_s13, %s1388_s26 }
  0x90   : > { %v536_v22 = vrot.slane %v526_v6, %v521_v61  ;;  %v591_v6 = vld [vmem:[%s1796_s5] sm:$0x1] }
  0x91   : > { %1168 = vmatpush1.bf16.msra.mxu1 %v1167_v21  ;;  %1232 = vmatpush1.bf16.msra.mxu0 %v1231_v23  ;;  %v532_v21 = vrot.slane %v522_v5, %v521_v61  ;;  %p1390_p2 = pnand %p1389_p10, %p1823_p1  ;;  %p1397_p8 = por %p1396_p7, %p1395_p4 }
  0x92   : > { %1170 = vmatprep.subr.bf16.mxu1 %v1169_v24  ;;  %1234 = vmatprep.subr.bf16.mxu0 %v1233_v28 }
  0x93   : > { %p1391_p3 = pneg %p1390_p2 }
  0x95   : > { %1172 = vmatpush1.bf16.msra.mxu1 %v1171_v35  ;;  %1236 = vmatpush1.bf16.msra.mxu0 %v1235_v37  ;;  %p1398_p11 = pnand %p1397_p8, %p1391_p3 }
  0x96   : > { %1174 = vmatprep.subr.bf16.mxu1 %v1173_v38  ;;  %1238 = vmatprep.subr.bf16.mxu0 %v1237_v41 }
  0x99   : > { %1176 = vmatpush1.bf16.msra.mxu1 %v1175_v45  ;;  %1240 = vmatpush1.bf16.msra.mxu0 %v1239_v47 }
  0x9c   : > { %847 = vmatmul.mubr.f32.vlgmr.msra.gmra.mrb[0].mxu1 %v652_v48  ;;  %918 = vmatmul.mubr.f32.vlgmr.msra.gmra.mrb[0].mxu0 %v630_v49 }
  0xd5   : > { %v479_v63 = vpop.permute.xlu1 %478  ;;  %v447_v2 = vpop.permute.xlu0 %446 }
  0xd6   : > { %v503_v7 = vmul.f32 %v498_v0, %v479_v63  ;;  %v504_v10 = vmul.f32 %v502_v1, %v479_v63  ;;  %v473_v13 = vmul.f32 %v468_v3, %v447_v2  ;;  %v474_v14 = vmul.f32 %v472_v4, %v447_v2 }
  0xd8   : > { %v507_v23 = vadd.f32 %v503_v7, %v473_v13  ;;  %v508_v24 = vadd.f32 %v504_v10, %v474_v14  ;;  %v595_v14 = vld [vmem:[%s1797_s6 + $0x8] sm:$0xff] }
  0xd9   : > { %v483_v15 = vpop.permute.xlu1 %482  ;;  %v452_v16 = vpop.permute.xlu0 %451 }
  0xda   : > { %v505_v17 = vmul.f32 %v498_v0, %v483_v15  ;;  %v506_v18 = vmul.f32 %v502_v1, %v483_v15  ;;  %v475_v19 = vmul.f32 %v468_v3, %v452_v16  ;;  %v476_v20 = vmul.f32 %v472_v4, %v452_v16  ;;  %v594_v15 = vld [vmem:[%s1797_s6] sm:$0xff] }
  0xdc   : > { %v509_v25 = vadd.f32 %v505_v17, %v475_v19  ;;  %v510_v26 = vadd.f32 %v506_v18, %v476_v20 }
  0xde   : > { %v517_v27 = vpop.permute.xlu1 %516  ;;  %v513_v28 = vpop.permute.xlu0 %512 }
  0xdf   : > { %v539_v29 = vmul.f32 %v532_v21, %v517_v27  ;;  %v540_v30 = vmul.f32 %v536_v22, %v517_v27  ;;  %v537_v31 = vmul.f32 %v532_v21, %v513_v28  ;;  %v538_v32 = vmul.f32 %v536_v22, %v513_v28  ;;  %v924_v21 = vld [vmem:[#allocation2] sm:$0x1]  ;;  %v609_v28 = vld [vmem:[%s1798_s7 + $0x8] sm:$0xff] }
  0xe1   : > { %v541_v33 = vadd.f32 %v537_v31, %v507_v23  ;;  %v542_v34 = vadd.f32 %v538_v32, %v508_v24  ;;  %v543_v35 = vadd.f32 %v539_v29, %v509_v25  ;;  %v544_v36 = vadd.f32 %v540_v30, %v510_v26  ;;  %v608_v29 = vld [vmem:[%s1798_s7] sm:$0xff] }
  0xe3   : > { %v550_v37 = vpop.permute.xlu1 %549  ;;  %v555_v38 = vpop.permute.xlu0 %554 }
  0xe4   : > { %v557_v39 = vadd.f32 %v550_v37, %v541_v33  ;;  %v558_v40 = vadd.f32 %v550_v37, %v542_v34  ;;  %v559_v41 = vadd.f32 %v555_v38, %v543_v35  ;;  %v560_v42 = vadd.f32 %v555_v38, %v544_v36 }
  0xe6   : > { %v561_v43 = vmax.f32 %v557_v39, 0.0  ;;  %v562_v44 = vmax.f32 %v558_v40, 0.0  ;;  %v563_v45 = vmax.f32 %v559_v41, 0.0  ;;  %v564_v46 = vmax.f32 %v560_v42, 0.0 }
  0xe8   : > { %v567_v47 = vadd.f32 %v563_v45, %v1686_v11  ;;  %v568_v48 = vadd.f32 %v564_v46, %v1676_v8  ;;  %v565_v49 = vadd.f32 %v561_v43, %v1689_v12  ;;  %v566_v50 = vadd.f32 %v562_v44, %v1679_v9 }
  0xea   : > { %v572_v51 = vadd.f32 %v568_v48, %v567_v47  ;;  %v569_v52 = vadd.f32 %v566_v50, %v565_v49 }
  0xec   : > { %573 = vadd.xlane.f32.xlu0 %v572_v51  ;;  %570 = vadd.xlane.f32.xlu1 %v569_v52 }
 0x16f   : > { %v848_v22 = vpop.f32.mrb[0].mxu1  ;;  %v919_v23 = vpop.f32.mrb[0].mxu0 }
 0x170   : > { %v850_v24 = vpop.f32.mrb[1].mxu1  ;;  %v921_v25 = vpop.f32.mrb[1].mxu0  ;;  %v920_v26 = vadd.f32 %v919_v23, %v848_v22 }
 0x171   : > { %v922_v27 = vadd.f32 %v921_v25, %v850_v24 }
 0x179   : > { %v574_v55 = vpop.xlane.xlu0 %573  ;;  %v571_v57 = vpop.xlane.xlu1 %570 }
 0x17a   : > { %v576_v58 = vmul.f32 0.00390625, %v574_v55  ;;  %v575_v59 = vmul.f32 0.00390625, %v571_v57 }
 0x17c   : > { %v580_v60 = vmul.f32 %v578_v53, %v576_v58  ;;  %v579_v61 = vmul.f32 %v577_v56, %v575_v59 }
 0x17e   : > { %v583_v62 = vsel %vm581_vm0, %v580_v60, 0.0  ;;  %v582_v63 = vsel %vm581_vm0, %v579_v61, 0.0 }
 0x17f   : > { %v584_v0 = vadd.f32 %v583_v62, %v582_v63 }
 0x181   : > { %v585_v1 = vrot.slane %v584_v0, 4 }
 0x183   : > { %v586_v2 = vadd.f32 %v585_v1, %v584_v0 }
 0x185   : > { %v587_v3 = vrot.slane %v586_v2, 2 }
 0x187   : > { %v588_v4 = vadd.f32 %v587_v3, %v586_v2 }
 0x189   : > { %v589_v5 = vrot.slane %v588_v4, 1 }
 0x18b   : > { %v590_v7 = vadd.f32 %v589_v5, %v588_v4 }
 0x18d   : > { %v592_v10 = vadd.f32 %v591_v6, %v590_v7 }
 0x18f   : > { %v593_v13 = vmax.f32 %v592_v10, 0.0 }
 0x191   : > { %v599_v16 = vrot.slane %v593_v13, %v1699_v54 }
 0x193   : > { %v601_v17 = vmul.f32 %v599_v16, %v595_v14  ;;  %v600_v18 = vmul.f32 %v599_v16, %v594_v15 }
 0x195   : > { %v605_v19 = vsel %vm581_vm0, %v601_v17, 0.0  ;;  %v602_v20 = vsel %vm581_vm0, %v600_v18, 0.0 }
 0x196   : > { %606 = vadd.xlane.f32.xlu0 %v605_v19  ;;  %603 = vadd.xlane.f32.xlu1 %v602_v20 }
 0x1a7   : > { %927 = vperm.xlu1 %1314, %v924_v21  }
 0x223   : > { %v607_v30 = vpop.xlane.xlu0 %606  ;;  %v604_v31 = vpop.xlane.xlu1 %603 }
 0x224   : > { %v611_v32 = vadd.f32 %v609_v28, %v607_v30  ;;  %v610_v33 = vadd.f32 %v608_v29, %v604_v31 }
 0x226   : > { %v1102_v34 = vmul.f32 -1.442695, %v611_v32  ;;  %v1101_v35 = vmul.f32 -1.442695, %v610_v33 }
 0x227   : > { %v928_v42 = vpop.permute.xlu1 %927 }
 0x228   : > { %1316 = vpow2.f32 %v1102_v34  ;;  %v933_v43 = vrot.slane %v928_v42, %v1699_v54 }
 0x229   : > { %1318 = vpow2.f32 %v1101_v35 }
 0x22a   : > { %v934_v44 = vadd.f32 %v933_v43, %v920_v26  ;;  %v935_v45 = vadd.f32 %v933_v43, %v922_v27 }
 0x22c   : > { %v1103_v46 = vmul.f32 -1.442695, %v934_v44  ;;  %v1104_v47 = vmul.f32 -1.442695, %v935_v45 }
 0x232   : > { %v1317_v36 = vpop.eup %1316 }
 0x233   : > { %v1319_v37 = vpop.eup %1318  ;;  %v619_v38 = vadd.f32 1.0, %v1317_v36 }
 0x234   : > { %v618_v39 = vadd.f32 1.0, %v1319_v37 }
 0x235   : > { %1320 = vrcp.f32 %v619_v38 }
 0x236   : > { %1322 = vrcp.f32 %v618_v39 }
 0x237   : > { %1324 = vpow2.f32 %v1103_v46 }
 0x238   : > { %1326 = vpow2.f32 %v1104_v47 }
 0x23f   : > { %v1321_v40 = vpop.eup %1320 }
 0x240   : > { %v1323_v41 = vpop.eup %1322  ;;  %955 = vperm.xlu1 %1314, %v1321_v40  }
 0x241   : > { %950 = vperm.xlu0 %1315, %v1323_v41   ;;  %v1325_v48 = vpop.eup %1324 }
 0x242   : > { %v1327_v49 = vpop.eup %1326  ;;  %v942_v50 = vadd.f32 1.0, %v1325_v48 }
 0x243   : > { %v943_v51 = vadd.f32 1.0, %v1327_v49 }
 0x244   : > { %1328 = vrcp.f32 %v942_v50 }
 0x245   : > { %1330 = vrcp.f32 %v943_v51 }
 0x24e   : > { %v1329_v52 = vpop.eup %1328 }
 0x24f   : > { %v1331_v53 = vpop.eup %1330  ;;  %v965_v57 = vrot.slane %v1329_v52, %v1699_v54 }
 0x250   : > { %v969_v58 = vrot.slane %v1331_v53, %v1699_v54 }
 0x2bf   : > { %v956_v55 = vpop.permute.xlu1 %955 }
 0x2c0   : > { %v951_v56 = vpop.permute.xlu0 %950  ;;  %v960_v59 = vmul.f32 %v956_v55, %v1686_v11  ;;  %v961_v60 = vmul.f32 %v956_v55, %v1676_v8 }
 0x2c1   : > { %v958_v61 = vmul.f32 %v951_v56, %v1689_v12  ;;  %v959_v62 = vmul.f32 %v951_v56, %v1679_v9 }
 0x2c2   : > { %v972_v63 = vmul.f32 %v965_v57, %v960_v59  ;;  %v973_v0 = vmul.f32 %v969_v58, %v961_v60 }
 0x2c3   : > { %v970_v11 = vmul.f32 %v965_v57, %v958_v61  ;;  %v971_v54 = vmul.f32 %v969_v58, %v959_v62 }
 0x2c4   : > { %976 = vst [vmem:[%s426_s16 + $0x10] sm:$0xff] %v972_v63  ;;  %977 = vst [vmem:[%s426_s16 + $0x18] sm:$0xff] %v973_v0 }
 0x2c5   : > { %974 = vst [vmem:[%s426_s16] sm:$0xff] %v970_v11  ;;  %975 = vst [vmem:[%s426_s16 + $0x8] sm:$0xff] %v971_v54 }
 0x2c6   : > { %1401 = shalt.err (!%p1398_p11)
}
 0x2c7   : > { %s1402_s21 = scalar_lea.hbm %s1748_s23, 512  ;;  %s1406_s30 = scalar_lea.hbm %s1802_s11, 1024 }
 0x2c8   : > { %p1403_p13 = scmp.ne.s32.totalorder %s1748_s23, %s1402_s21  ;;  %p1407_p6 = scmp.lt.u32.totalorder %s1748_s23, %s1802_s11 }
 0x2c9   : > { %p1408_p9 = scmp.lt.u32.totalorder %s1406_s30, %s1402_s21  ;;  %p1410_p10 = scmp.lt.u32.totalorder %s1402_s21, %s1748_s23 }
 0x2ca   : > { %p1404_p5 = pnand %p1403_p13, %p1823_p1 }
 0x2cb   : > { %p1409_p12 = por %p1408_p9, %p1407_p6 }
 0x2cc   : > { %p1405_p0 = pneg %p1404_p5 }
 0x2cd   : > { %p1411_p2 = por %p1410_p10, %p1409_p12 }
 0x2cf   : > { %p1412_p3 = pnand %p1411_p2, %p1405_p0 }
 0x2d1   : > { %1415 = shalt.err (!%p1412_p3)
}
 0x2d2   : > { %s1468_s18 = smov 256   ;;  %s1469_s10 = smov 16  }
 0x2d3   : > { %1251 = dma.vmem_to_hbm [thread:$0]  (%p1823_p1), %s1743_s17, 512, %s1748_s23, %s1750_s25, %s1468_s18, %s1468_s18, %s1469_s10  }
 0x2d4 PF: > { %s1824_s27 = sld [smem:[#allocation15_spill]]  ;;  %p1268_p4 = scmp.ge.s32.totalorder %s1458_s22, 2 }
 0x2d5   : > { %s1007_s26 = sand.u32 1, %s1446_s19  }
 0x2d6   : > { %s1008_s12 = scalar_lea.sflag [#allocation5], %s1007_s26 }
 0x2da   : > { %p1825_p7 = scmp.ne.s32.totalorder %s1824_s27, 0 }
 0x2dc   : > { %p1261_p8 = pnand %p1268_p4, %p1825_p7 }
 0x2de   : > { %1441 = dma.done.wait (!%p1261_p8), %s1008_s12, 512  }
 0x2df   : > { %1443 = vsyncadd (!%p1261_p8), %s1008_s12, 4294966784  ;;  %s1826_s22 = sld [smem:[#allocation13_spill]]  ;;  %s1827_s15 = sld [smem:[#allocation12_spill]] }
 0x2e0   : > { %s1828_s21 = sld [smem:[#allocation14_spill]]  ;;  %s1829_s19 = smov %s1450_s20 }
 0x2e5   : > { %p25_p11 = scmp.ge.s32.totalorder %s1826_s22, 4   ;;  %s1830_s20 = smov %s1827_s15 }
 0x2e7   :  { %27 = sbr.rel (!%p25_p11) target bundleno = 8 (0x8), region = 111 }
 0x2ee   :  { %1013 = vsyncpa [#allocation4], 1 }
 0x2ef   :  { %1015 = vsyncpa [#allocation4 + $0x1], 1 }
 0x2f0   :  { %1016 = vsyncpa [#allocation7], 1 }
 0x2f1   :  { %1017 = vsyncpa [#allocation5], 1 }
 0x2f2   :  { %1019 = vsyncpa [#allocation5 + $0x1], 1 }

</bundles_post_ra>
